<compile_context>
chip_gen: v7x
topology: tpu7x:2x2x1
jax: 0.10.0
libtpu: 0.0.40
codegen_flags: <defaults>
</compile_context>

<pallas_src>
import functools

import jax
import jax.numpy as jnp
from jax.experimental import pallas as pl
from jax.experimental.pallas import tpu as pltpu


def _masked_mean_kernel(x_ref, m_ref, o_ref, acc_ref, cnt_ref, *,
                        seq_len, seq_tile):
    """One (tb, tl, te) tile of masked mean pooling.

    x_ref   : VMEM (tb, tl, te) input dtype
    m_ref   : VMEM (tb, tl)     f32 0/1 mask
    o_ref   : VMEM (tb, te)     output (written on the last L step)
    acc_ref : VMEM (tb, te)     f32 running masked sum
    cnt_ref : VMEM (tb, 1)      f32 running valid count
    """
    l = pl.program_id(2)

    @pl.when(l == 0)
    def _():
        acc_ref[...] = jnp.zeros_like(acc_ref)
        cnt_ref[...] = jnp.zeros_like(cnt_ref)

    m = m_ref[...]                                      # (tb, tl)
    if seq_len % seq_tile != 0:
        # Last L block is partial: zero the out-of-range mask columns so that
        # neither the count nor the sum picks up garbage from the padded tile.
        pos = l * seq_tile + jax.lax.broadcasted_iota(jnp.int32, m.shape, 1)
        m = jnp.where(pos < seq_len, m, 0.0)

    x = x_ref[...].astype(jnp.float32)                  # (tb, tl, te)
    # masked_fill(~mask, 0): use where (not x * m) so NaN/Inf in masked or
    # padded positions cannot leak into the sum.
    xm = jnp.where(m[:, :, None] != 0.0, x, 0.0)

    acc_ref[...] += jnp.sum(xm, axis=1)                 # (tb, te) sublane reduce
    cnt_ref[...] += jnp.sum(m, axis=1, keepdims=True)   # (tb, 1)  lane reduce

    @pl.when(l == pl.num_programs(2) - 1)
    def _():
        # count == 0 -> 1 clamp, one exact divide per row, broadcast multiply.
        inv = 1.0 / jnp.maximum(cnt_ref[...], 1.0)
        o_ref[...] = (acc_ref[...] * inv).astype(o_ref.dtype)


_TARGET_BLOCK_BYTES = 4 << 20   # aim for multi-MiB x blocks (HBM-BW knee)
_MAX_BLOCK_BYTES = 8 << 20      # 2 x-buffers -> 16 MiB: fits all generations


def _round_down(v, m):
    return (v // m) * m


def _select_tiles(B, L, E, itemsize):
    # Batch tile: multiple of 8 sublanes (or all of B when B < 8), sized so a
    # single x block is a few MiB.
    if B <= 8:
        tb = B
    else:
        per_row = L * E * itemsize
        tb = max(8, min(_round_down(B, 8),
                        _round_down(max(_TARGET_BLOCK_BYTES // per_row, 8), 8)))
        if B >= 16:  # keep >= 2 batch blocks so both v7x TensorCores get work
            tb = max(8, min(tb, _round_down((B + 1) // 2, 8)))
    # Feature tile: full E if it fits, otherwise a multiple of 128 lanes.
    te = E
    if tb * L * te * itemsize > _MAX_BLOCK_BYTES and E > 128:
        te = min(E, max(128, _round_down(
            _MAX_BLOCK_BYTES // (tb * L * itemsize), 128)))
    # Sequence tile: full L if it fits, otherwise a multiple of 128 (the mask
    # block's lane dim), handled as a grid reduction axis.
    tl = L
    if tb * tl * te * itemsize > _MAX_BLOCK_BYTES and L > 128:
        tl = min(L, max(128, _round_down(
            _MAX_BLOCK_BYTES // (tb * te * itemsize), 128)))
    return tb, tl, te


def sequence_avg_pool(x, x_mask, *, batch_tile=None, seq_tile=None, feat_tile=None):
    """x: (B, L, E) float, x_mask: (B, L, 1) or (B, L) bool -> (B, E)."""
    B, L, E = x.shape
    if x_mask.ndim == 3:
        x_mask = x_mask[:, :, 0]                 # compact (B, L)
    m = x_mask.astype(jnp.float32)               # 0/1 mask, 1/E of x's traffic

    tb, tl, te = _select_tiles(B, L, E, x.dtype.itemsize)
    if batch_tile is not None:
        tb = batch_tile
    if seq_tile is not None:
        tl = seq_tile
    if feat_tile is not None:
        te = feat_tile

    nb, ne, nl = pl.cdiv(B, tb), pl.cdiv(E, te), pl.cdiv(L, tl)
    kernel = functools.partial(_masked_mean_kernel, seq_len=L, seq_tile=tl)

    # TODO(synk): for E < 128 a lane-dense output would need padding E in HBM
    # (an extra pass over x), so sub-128 outputs keep masked stores.
    return pl.pallas_call(
        kernel,
        out_shape=jax.ShapeDtypeStruct((B, E), x.dtype),
        grid_spec=pltpu.PrefetchScalarGridSpec(
            num_scalar_prefetch=0,
            grid=(nb, ne, nl),
            in_specs=[
                pl.BlockSpec((tb, tl, te), lambda b, e, l: (b, l, e)),
                pl.BlockSpec((tb, tl), lambda b, e, l: (b, l)),
            ],
            out_specs=pl.BlockSpec((tb, te), lambda b, e, l: (b, e)),
            scratch_shapes=[
                pltpu.VMEM((tb, te), jnp.float32),   # masked-sum accumulator
                pltpu.VMEM((tb, 1), jnp.float32),    # valid-count accumulator
            ],
        ),
        compiler_params=pltpu.CompilerParams(
            dimension_semantics=("parallel", "parallel", "arbitrary"),
            # Above v5e's 16 MiB scoped default, comfortably inside v7x's 64 MiB.
            vmem_limit_bytes=40 << 20,
        ),
    )(x, m)


def sequence_avg_pool_ref(x, x_mask):
    """Pure-JAX reference matching the PyTorch forward."""
    if x_mask.ndim == 2:
        x_mask = x_mask[:, :, None]
    xm = jnp.where(x_mask, x, 0.0)
    active = jnp.sum(x_mask, axis=-2)
    active = jnp.where(active == 0, 1, active)
    return jnp.sum(xm, axis=-2) / active


if __name__ == "__main__":
    key = jax.random.PRNGKey(0)

    # --- Case 1: small shapes typical of the module (auto tiling) ----------
    B, L, E = 4, 8, 32
    k1, key = jax.random.split(key)
    x = jax.random.normal(k1, (B, L, E), jnp.float32)
    lengths = jnp.array([5, 0, 8, 3], dtype=jnp.int32)      # includes an all-masked row
    x_mask = (jnp.arange(L)[None, :] < lengths[:, None])[:, :, None]   # (B, L, 1) bool

    out = jax.block_until_ready(sequence_avg_pool(x, x_mask))
    ref = sequence_avg_pool_ref(x, x_mask)
    assert out.shape == (B, E), out.shape
    assert jnp.allclose(out, ref, atol=1e-5, rtol=1e-5), float(jnp.max(jnp.abs(out - ref)))

    # --- Case 2: non-divisible B / L / E, explicit small tiles to exercise
    #     the partial-block, E-tiling and L-reduction paths -------------------
    B2, L2, E2 = 20, 160, 200
    k2, k3, key = jax.random.split(key, 3)
    x2 = jax.random.normal(k2, (B2, L2, E2), jnp.float32)
    mask2 = jax.random.bernoulli(k3, 0.7, (B2, L2, 1))
    mask2 = mask2.at[3].set(False)                           # one fully masked row

    out2 = jax.block_until_ready(
        sequence_avg_pool(x2, mask2, batch_tile=8, seq_tile=128, feat_tile=128))
    ref2 = sequence_avg_pool_ref(x2, mask2)
    assert out2.shape == (B2, E2), out2.shape
    assert jnp.allclose(out2, ref2, atol=1e-5, rtol=1e-5), float(jnp.max(jnp.abs(out2 - ref2)))

    print("KERNEL_OK")
</pallas_src>

<mosaic_0001>
module attributes {stable_mosaic.version = 11 : i64} {
  func.func @_masked_mean_kernel(%arg0: i32, %arg1: i32, %arg2: i32, %arg3: memref<4x8x32xf32, #tpu.memory_space<vmem>>, %arg4: memref<4x8xf32, #tpu.memory_space<vmem>>, %arg5: memref<4x32xf32, #tpu.memory_space<vmem>>, %arg6: memref<4x32xf32, #tpu.memory_space<vmem>>, %arg7: memref<4x1xf32, #tpu.memory_space<vmem>>) attributes {dimension_semantics = [#tpu.dimension_semantics<parallel>, #tpu.dimension_semantics<parallel>, #tpu.dimension_semantics<arbitrary>], iteration_bounds = array<i64: 1, 1, 1>, scalar_prefetch = 0 : i64, scratch_operands = 2 : i64, tpu.core_type = #tpu.core_type<tc>, window_params = [{transform_indices = @transform_0, window_bounds = array<i64: 4, 8, 32>}, {transform_indices = @transform_1, window_bounds = array<i64: 4, 8>}, {transform_indices = @transform_2, window_bounds = array<i64: 4, 32>}]} {
    %c0_i32 = arith.constant 0 : i32
    %0 = arith.cmpi eq, %arg2, %c0_i32 : i32
    %1 = arith.extui %0 : i1 to i32
    %c0_i32_0 = arith.constant 0 : i32
    %2 = arith.cmpi ne, %1, %c0_i32_0 : i32
    scf.if %2 {
      %cst_18 = arith.constant 0.000000e+00 : f32
      %24 = vector.broadcast %cst_18 : f32 to vector<4x32xf32>
      %c0_19 = arith.constant 0 : index
      %c0_20 = arith.constant 0 : index
      %25 = vector.load %arg6[%c0_19, %c0_20] : memref<4x32xf32, #tpu.memory_space<vmem>>, vector<4x32xf32>
      tpu.vector_store %arg6[%c0_19, %c0_20], %24 {strides = array<i32>} : memref<4x32xf32, #tpu.memory_space<vmem>>, vector<4x32xf32>,
      %cst_21 = arith.constant 0.000000e+00 : f32
      %26 = vector.broadcast %cst_21 : f32 to vector<4x1xf32>
      %c0_22 = arith.constant 0 : index
      %c0_23 = arith.constant 0 : index
      %27 = vector.load %arg7[%c0_22, %c0_23] : memref<4x1xf32, #tpu.memory_space<vmem>>, vector<4x1xf32>
      tpu.vector_store %arg7[%c0_22, %c0_23], %26 {strides = array<i32>} : memref<4x1xf32, #tpu.memory_space<vmem>>, vector<4x1xf32>,
    } else {
    }
    %c0 = arith.constant 0 : index
    %c0_1 = arith.constant 0 : index
    %3 = vector.load %arg4[%c0, %c0_1] : memref<4x8xf32, #tpu.memory_space<vmem>>, vector<4x8xf32>
    %c0_2 = arith.constant 0 : index
    %c0_3 = arith.constant 0 : index
    %c0_4 = arith.constant 0 : index
    %4 = vector.load %arg3[%c0_2, %c0_3, %c0_4] : memref<4x8x32xf32, #tpu.memory_space<vmem>>, vector<4x8x32xf32>
    %5 = vector.shape_cast %3 : vector<4x8xf32> to vector<4x8x1xf32>
    %cst = arith.constant 0.000000e+00 : f32
    %6 = vector.broadcast %cst : f32 to vector<4x8x1xf32>
    %7 = arith.cmpf one, %5, %6 : vector<4x8x1xf32>
    %cst_5 = arith.constant 0.000000e+00 : f32
    %8 = vector.shape_cast %7 : vector<4x8x1xi1> to vector<4x8x1xi1>
    %9 = vector.broadcast %8 : vector<4x8x1xi1> to vector<4x8x32xi1>
    %10 = vector.broadcast %cst_5 : f32 to vector<4x8x32xf32>
    %11 = arith.select %9, %4, %10 : vector<4x8x32xi1>, vector<4x8x32xf32>
    %c0_6 = arith.constant 0 : index
    %c0_7 = arith.constant 0 : index
    %12 = vector.load %arg6[%c0_6, %c0_7] : memref<4x32xf32, #tpu.memory_space<vmem>>, vector<4x32xf32>
    %cst_8 = arith.constant dense<0.000000e+00> : vector<4x32xf32>
    %13 = vector.multi_reduction <add>, %11, %cst_8 [1] : vector<4x8x32xf32> to vector<4x32xf32>
    %14 = arith.addf %12, %13 : vector<4x32xf32>
    %c0_9 = arith.constant 0 : index
    %c0_10 = arith.constant 0 : index
    %15 = vector.load %arg6[%c0_9, %c0_10] : memref<4x32xf32, #tpu.memory_space<vmem>>, vector<4x32xf32>
    tpu.vector_store %arg6[%c0_9, %c0_10], %14 {strides = array<i32>} : memref<4x32xf32, #tpu.memory_space<vmem>>, vector<4x32xf32>,
    %c0_11 = arith.constant 0 : index
    %c0_12 = arith.constant 0 : index
    %16 = vector.load %arg7[%c0_11, %c0_12] : memref<4x1xf32, #tpu.memory_space<vmem>>, vector<4x1xf32>
    %cst_13 = arith.constant dense<0.000000e+00> : vector<4xf32>
    %17 = vector.multi_reduction <add>, %3, %cst_13 [1] : vector<4x8xf32> to vector<4xf32>
    %18 = vector.shape_cast %17 : vector<4xf32> to vector<4x1xf32>
    %19 = arith.addf %16, %18 : vector<4x1xf32>
    %c0_14 = arith.constant 0 : index
    %c0_15 = arith.constant 0 : index
    %20 = vector.load %arg7[%c0_14, %c0_15] : memref<4x1xf32, #tpu.memory_space<vmem>>, vector<4x1xf32>
    tpu.vector_store %arg7[%c0_14, %c0_15], %19 {strides = array<i32>} : memref<4x1xf32, #tpu.memory_space<vmem>>, vector<4x1xf32>,
    %c0_i32_16 = arith.constant 0 : i32
    %21 = arith.cmpi eq, %arg2, %c0_i32_16 : i32
    %22 = arith.extui %21 : i1 to i32
    %c0_i32_17 = arith.constant 0 : i32
    %23 = arith.cmpi ne, %22, %c0_i32_17 : i32
    scf.if %23 {
      %c0_18 = arith.constant 0 : index
      %c0_19 = arith.constant 0 : index
      %24 = vector.load %arg7[%c0_18, %c0_19] : memref<4x1xf32, #tpu.memory_space<vmem>>, vector<4x1xf32>
      %cst_20 = arith.constant 1.000000e+00 : f32
      %25 = vector.broadcast %cst_20 : f32 to vector<4x1xf32>
      %26 = arith.maximumf %24, %25 : vector<4x1xf32>
      %cst_21 = arith.constant 1.000000e+00 : f32
      %27 = vector.broadcast %cst_21 : f32 to vector<4x1xf32>
      %28 = arith.divf %27, %26 : vector<4x1xf32>
      %c0_22 = arith.constant 0 : index
      %c0_23 = arith.constant 0 : index
      %29 = vector.load %arg6[%c0_22, %c0_23] : memref<4x32xf32, #tpu.memory_space<vmem>>, vector<4x32xf32>
      %30 = vector.broadcast %28 : vector<4x1xf32> to vector<4x32xf32>
      %31 = arith.mulf %29, %30 : vector<4x32xf32>
      %c0_24 = arith.constant 0 : index
      %c0_25 = arith.constant 0 : index
      %32 = vector.load %arg5[%c0_24, %c0_25] : memref<4x32xf32, #tpu.memory_space<vmem>>, vector<4x32xf32>
      tpu.vector_store %arg5[%c0_24, %c0_25], %31 {strides = array<i32>} : memref<4x32xf32, #tpu.memory_space<vmem>>, vector<4x32xf32>,
    } else {
    }
    return
  }
  func.func @transform_0(%arg0: i32, %arg1: i32, %arg2: i32) -> (i32, i32, i32) {
    %c0_i32 = arith.constant 0 : i32
    return %arg0, %arg2, %arg1 : i32, i32, i32
  }
  func.func @transform_1(%arg0: i32, %arg1: i32, %arg2: i32) -> (i32, i32) {
    %c0_i32 = arith.constant 0 : i32
    return %arg0, %arg2 : i32, i32
  }
  func.func @transform_2(%arg0: i32, %arg1: i32, %arg2: i32) -> (i32, i32) {
    %c0_i32 = arith.constant 0 : i32
    return %arg0, %arg1 : i32, i32
  }
}

</mosaic_0001>

<bundles_post_ra>
// kernel: tpu_custom_call.1
= control target key start
LH: loop header
LB: loop body
LE: loop exit
PB: predicated region body
PF: predicated region fallthrough
CT: control target
= control target key end

     0   :  { %7 = vsyncpa [#allocation5], 0  ;;  %s328_s0 = inlined_call_operand.hbm [shape: f32[4,8,32], index: 0, kind: input, shape index: {}]   ;;  %s329_s1 = inlined_call_operand.hbm [shape: f32[4,8], index: 1, kind: input, shape index: {}]   ;;  %s330_s2 = inlined_call_operand.hbm [shape: f32[4,32], index: 2, kind: output, shape index: {}]  }
   0x1   :  { %8 = vsyncpa [#allocation8], 0 }
   0x2   :  { %9 = vsyncpa [#allocation6], 0  ;;  %s261_s9 = smov [#allocation4]   ;;  %s189_s13 = scalar_lea.hbm %s328_s0, 512 }
   0x3   :  { %s15_s10 = sshll.u32 %s261_s9, 4  ;;  %p190_p0 = scmp.ne.s32.totalorder %s328_s0, %s189_s13  ;;  %s16_s10 = int_to_ptr.vmem [resolvable:$true] %s15_s10 }
   0x4   :  { %p193_p1 = scmp.lt.u32.totalorder %s189_s13, %s328_s0 }
   0x6   :  { %p195_p2 = pnand %p193_p1, %p190_p0 }
   0x8   :  { %198 = shalt.err (!%p195_p2)
}
   0x9   :  { %s199_s18 = scalar_lea.vmem %s16_s10, 512  ;;  %p204_p4 = scmp.lt.s32.totalorder %s16_s10, %s16_s10 }
   0xa   :  { %p200_p3 = scmp.ne.s32.totalorder %s16_s10, %s199_s18  ;;  %p205_p5 = scmp.lt.s32.totalorder %s199_s18, %s199_s18 }
   0xc   :  { %p206_p6 = por %p205_p5, %p204_p4 }
   0xe   :  { %p207_p7 = pnand %p206_p6, %p200_p3 }
  0x10   :  { %210 = shalt.err (!%p207_p7)
}
  0x11   :  { %s262_s19 = smov 128   ;;  %s263_s20 = smov 8  }
  0x12   :  { %21 = dma.hbm_to_vmem [thread:$0]  %s328_s0, 512, %s16_s10, [#allocation5], %s262_s19, %s262_s19, %s263_s20  }
  0x13   :  { %s264_s23 = smov [#allocation7]   ;;  %s211_s27 = scalar_lea.hbm %s329_s1, 64 }
  0x14   :  { %s28_s24 = sshll.u32 %s264_s23, 4  ;;  %p212_p8 = scmp.ne.s32.totalorder %s329_s1, %s211_s27  ;;  %s29_s24 = int_to_ptr.vmem [resolvable:$true] %s28_s24 }
  0x15   :  { %p215_p9 = scmp.lt.u32.totalorder %s211_s27, %s329_s1 }
  0x17   :  { %p217_p10 = pnand %p215_p9, %p212_p8 }
  0x19   :  { %220 = shalt.err (!%p217_p10)
}
  0x1a   :  { %s221_s4 = scalar_lea.vmem %s29_s24, 64  ;;  %p226_p12 = scmp.lt.s32.totalorder %s29_s24, %s29_s24 }
  0x1b   :  { %p222_p11 = scmp.ne.s32.totalorder %s29_s24, %s221_s4  ;;  %p227_p13 = scmp.lt.s32.totalorder %s221_s4, %s221_s4 }
  0x1d   :  { %p228_p0 = por %p227_p13, %p226_p12 }
  0x1f   :  { %p229_p1 = pnand %p228_p0, %p222_p11 }
  0x21   :  { %232 = shalt.err (!%p229_p1)
}
  0x22   :  { %31 = dma.hbm_to_vmem [thread:$0]  %s329_s1, 64, %s29_s24, [#allocation8]  }
  0x23   :  { %255 = dma.done.wait [#allocation5], 512  }
  0x24   :  { %256 = vsyncadd [#allocation5], 4294966784 }
  0x25   :  { %257 = dma.done.wait [#allocation8], 64  }
  0x26   :  { %258 = vsyncadd [#allocation8], 4294967232  ;;  %v51_v0 = vlaneseq  ;;  %vm44_vm0 = vcmask 3072   ;;  %v265_v1 = vmov 0.0   ;;  %vm140_vm1 = vcmask 60416   ;;  %v48_v17 = vld [vmem:[#allocation4 + $0x8] sm:$0xff] }
  0x27   :  { %45 = vst.msk [vmem:[#allocation3] sm:$0xf] %vm44_vm0, %v265_v1  ;;  %v46_v5 = vld [vmem:[#allocation7] sm:$0xf]  ;;  %v266_v12 = vmov 0   ;;  %vm42_vm2 = vcmask 257024  }
  0x28   :  { %v52_v2 = vshrl.u32 %v51_v0, 7  ;;  %v141_v6 = vsel %vm140_vm1, %v46_v5, 0.0  ;;  %185 = vset.pattern.permute.xlu1 %v266_v12  ;;  %186 = vset.pattern.permute.xlu0 %v266_v12  ;;  %43 = vst.msk [vmem:[#allocation2] sm:$0xf] %vm42_vm2, %v265_v1  ;;  %v49_v18 = vld [vmem:[#allocation4 + $0x10] sm:$0xff]  ;;  %v50_v19 = vld [vmem:[#allocation4 + $0x18] sm:$0xff] }
  0x29   :  { %142 = vadd.xlane.f32.xlu0 %v141_v6  ;;  %vm96_vm6 = vcmask 261120   ;;  %v47_v35 = vld [vmem:[#allocation4] sm:$0xff]  ;;  %vm129_vm8 = vcmask 1041409   ;;  %vm131_vm9 = vcmask 1042434   ;;  %vm133_vm10 = vcmask 1043459   ;;  %s267_s1 = smov [#allocation9]  }
  0x2a   :  { %v60_v3 = vsub.s32 1, %v52_v2  ;;  %v67_v4 = vsub.s32 2, %v52_v2  ;;  %v74_v9 = vsub.s32 3, %v52_v2  ;;  %v53_v11 = vsub.s32 0, %v52_v2  ;;  %s168_s6 = sshll.u32 %s267_s1, 4  ;;  %s169_s6 = int_to_ptr.vmem [resolvable:$true] %s168_s6 }
  0x2b   :  { %s233_s7 = scalar_lea.vmem %s169_s6, 64  ;;  %p238_p3 = scmp.lt.s32.totalorder %s169_s6, %s169_s6 }
  0x2c   :  { %v61_v7 = vrot.slane %v46_v5, %v60_v3  ;;  %v68_v8 = vrot.slane %v46_v5, %v67_v4  ;;  %v75_v10 = vrot.slane %v46_v5, %v74_v9  ;;  %v54_v13 = vrot.slane %v46_v5, %v53_v11  ;;  %p234_p2 = scmp.ne.s32.totalorder %s169_s6, %s233_s7  ;;  %p239_p4 = scmp.lt.s32.totalorder %s233_s7, %s233_s7 }
  0x2e   :  { %63 = vbcast.lane.b32.xlu1 %v61_v7, 256  ;;  %v139_v28 = vld [vmem:[#allocation3] sm:$0xf]  ;;  %p240_p5 = por %p239_p4, %p238_p3 }
  0x2f   :  { %v95_v60 = vld [vmem:[#allocation2] sm:$0xf] }
  0x30   :  { %p241_p6 = pnand %p240_p5, %p234_p2 }
  0x32   :  { %70 = vbcast.lane.b32.xlu1 %v68_v8, 256 }
  0x36   :  { %77 = vbcast.lane.b32.xlu1 %v75_v10, 256 }
  0x3f   :  { %56 = vbcast.lane.b32.xlu0 %v54_v13, 256 }
  0xa0   :  { %v64_v14 = vpop.permute.xlu1 %63 }
  0xa1   :  { %vm80_vm3 = vcmp.ne.f32.partialorder %v64_v14, 0.0 }
  0xa2   :  { %v92_v20 = vsel %vm80_vm3, %v48_v17, 0.0 }
  0xa3   :  { %v104_v23 = vsel %vm96_vm6, %v92_v20, 0.0 }
  0xa4   :  { %v71_v15 = vpop.permute.xlu1 %70  ;;  %v105_v26 = vrot.slane %v104_v23, 4 }
  0xa5   :  { %vm81_vm4 = vcmp.ne.f32.partialorder %v71_v15, 0.0 }
  0xa6   :  { %v93_v21 = vsel %vm81_vm4, %v49_v18, 0.0  ;;  %v106_v31 = vadd.f32 %v105_v26, %v104_v23 }
  0xa7   :  { %v111_v24 = vsel %vm96_vm6, %v93_v21, 0.0 }
  0xa8   :  { %v78_v16 = vpop.permute.xlu1 %77  ;;  %v112_v27 = vrot.slane %v111_v24, 4  ;;  %v107_v36 = vrot.slane %v106_v31, 2 }
  0xa9   :  { %vm82_vm5 = vcmp.ne.f32.partialorder %v78_v16, 0.0 }
  0xaa   :  { %v94_v22 = vsel %vm82_vm5, %v50_v19, 0.0  ;;  %v113_v33 = vadd.f32 %v112_v27, %v111_v24  ;;  %v108_v42 = vadd.f32 %v107_v36, %v106_v31 }
  0xab   :  { %v118_v25 = vsel %vm96_vm6, %v94_v22, 0.0 }
  0xac   :  { %v119_v29 = vrot.slane %v118_v25, 4  ;;  %v114_v38 = vrot.slane %v113_v33, 2  ;;  %v109_v49 = vrot.slane %v108_v42, 1 }
  0xae   :  { %v120_v34 = vadd.f32 %v119_v29, %v118_v25  ;;  %v115_v44 = vadd.f32 %v114_v38, %v113_v33  ;;  %v110_v54 = vadd.f32 %v109_v49, %v108_v42 }
  0xb0   :  { %v121_v40 = vrot.slane %v120_v34, 2  ;;  %v116_v51 = vrot.slane %v115_v44, 1 }
  0xb2   :  { %v122_v47 = vadd.f32 %v121_v40, %v120_v34  ;;  %v117_v56 = vadd.f32 %v116_v51, %v115_v44 }
  0xb4   :  { %v123_v53 = vrot.slane %v122_v47, 1 }
  0xb6   :  { %v143_v30 = vpop.xlane.xlu0 %142  ;;  %v124_v58 = vadd.f32 %v123_v53, %v122_v47 }
  0xb7   :  { %v144_v32 = vadd.f32 %v143_v30, %v139_v28 }
  0xb9   :  { %146 = vst.msk [vmem:[#allocation3] sm:$0xf] %vm44_vm0, %v144_v32 }
  0xba   :  { %v57_v37 = vpop.permute.xlu0 %56 }
  0xbb   :  { %vm79_vm7 = vcmp.ne.f32.partialorder %v57_v37, 0.0 }
  0xbc   :  { %v91_v39 = vsel %vm79_vm7, %v47_v35, 0.0 }
  0xbd   :  { %v97_v41 = vsel %vm96_vm6, %v91_v39, 0.0 }
  0xbe   :  { %v98_v43 = vrot.slane %v97_v41, 4 }
  0xc0   :  { %v150_v45 = vld [vmem:[#allocation3] sm:$0xf]  ;;  %v99_v46 = vadd.f32 %v98_v43, %v97_v41 }
  0xc1   :  { %v151_v48 = vmax.f32 %v150_v45, 1.0 }
  0xc2   :  { %v100_v50 = vrot.slane %v99_v46, 2 }
  0xc3   :  { %187 = vrcp.f32 %v151_v48 }
  0xc4   :  { %v101_v52 = vadd.f32 %v100_v50, %v99_v46 }
  0xc6   :  { %v102_v55 = vrot.slane %v101_v52, 1 }
  0xc8   :  { %v103_v57 = vadd.f32 %v102_v55, %v101_v52 }
  0xca   :  { %v130_v59 = vsel %vm129_vm8, %v110_v54, %v103_v57 }
  0xcb   :  { %v132_v61 = vsel %vm131_vm9, %v117_v56, %v130_v59 }
  0xcc   :  { %v134_v62 = vsel %vm133_vm10, %v124_v58, %v132_v61 }
  0xcd   :  { %v188_v63 = vpop.eup %187  ;;  %v136_v0 = vadd.f32 %v134_v62, %v95_v60 }
  0xce   :  { %157 = vperm.xlu1 %185, %v188_v63  }
  0xcf   :  { %138 = vst.msk [vmem:[#allocation2] sm:$0xf] %vm42_vm2, %v136_v0 }
  0xd6   :  { %v154_v2 = vld [vmem:[#allocation2] sm:$0xf] }
 0x14d   :  { %v158_v1 = vpop.permute.xlu1 %157 }
 0x14e   :  { %v160_v3 = vmul.f32 %v158_v1, %v154_v2 }
 0x150   :  { %161 = vst.msk [vmem:[#allocation9] sm:$0xf] %vm42_vm2, %v160_v3 }
 0x151   :  { %244 = shalt.err (!%p241_p6)
}
 0x152   :  { %s245_s10 = scalar_lea.hbm %s330_s2, 64 }
 0x153   :  { %p246_p7 = scmp.ne.s32.totalorder %s330_s2, %s245_s10  ;;  %p249_p8 = scmp.lt.u32.totalorder %s245_s10, %s330_s2 }
 0x155   :  { %p251_p9 = pnand %p249_p8, %p246_p7 }
 0x157   :  { %254 = shalt.err (!%p251_p9)
}
 0x158   :  { %171 = dma.vmem_to_hbm [thread:$0]  %s169_s6, 64, %s330_s2, [#allocation6]  }
 0x159   :  { %259 = dma.done.wait [#allocation6], 64  }
 0x15a   :  { %260 = vsyncadd [#allocation6], 4294967232 }
 0x15b   :  { %175 = vsyncpa [#allocation5], 1 }
 0x15c   :  { %176 = vsyncpa [#allocation8], 1 }
 0x15d   :  { %177 = vsyncpa [#allocation6], 1 }

</bundles_post_ra>
